<compile_context>
chip_gen: v7x
topology: tpu7x:2x2x1
jax: 0.10.0
libtpu: 0.0.40
codegen_flags: <defaults>
</compile_context>

<pallas_src>
import jax
import jax.numpy as jnp
from jax.experimental import pallas as pl
from jax.experimental.pallas import tpu as pltpu


def _mlp_kernel(x_ref,
                w1_ref, b1_ref,
                w2_ref, b2_ref,
                w3_ref, b3_ref,
                w4_ref, b4_ref,
                w5_ref, b5_ref,
                o_ref):
    """Fused 4x(Linear+ReLU) -> Linear(1) forward for one batch tile.

    Feature-major layout (batch on lanes):
      x_ref:        (D_in, bt)   bf16
      w{1..4}_ref:  (out, in)    bf16   (PyTorch layout, no transpose needed)
      b{1..4}_ref:  (out, 1)     f32    (broadcast across lanes)
      w5_ref:       (1, H4)      bf16
      b5_ref:       (1, 1)       f32
      o_ref:        (1, bt)      f32    (lane-dense store)
    """
    z = x_ref[...]                                   # (D_in, bt) bf16
    for w_ref, b_ref in ((w1_ref, b1_ref), (w2_ref, b2_ref),
                         (w3_ref, b3_ref), (w4_ref, b4_ref)):
        acc = jnp.dot(w_ref[...], z, preferred_element_type=jnp.float32)
        z = jnp.maximum(acc + b_ref[...], 0.0).astype(jnp.bfloat16)
    out = jnp.dot(w5_ref[...], z, preferred_element_type=jnp.float32)
    o_ref[...] = out + b5_ref[...]


# ---------------------------------------------------------------------------
# Wrapper


def prepare_params(params):
    """One-time packing of PyTorch-style [(W[out,in], b[out]), ...] params
    into kernel-ready layouts (bf16 weights kept [out,in], biases (out,1) f32)."""
    *hidden, (w_out, b_out) = params
    packed = []
    for w, b in hidden:
        packed.append((jnp.asarray(w, jnp.float32).astype(jnp.bfloat16),   # (out, in)
                       jnp.asarray(b, jnp.float32).reshape(-1, 1)))        # (out, 1)
    packed.append((jnp.asarray(w_out, jnp.float32).astype(jnp.bfloat16),   # (1, H4)
                   jnp.asarray(b_out, jnp.float32).reshape(1, 1)))         # (1, 1)
    return packed


def _is_multi_core_chip():
    # Only v7x has 2 TensorCores per chip; elsewhere the grid is a serial loop
    # and splitting a tile just adds per-step overhead.
    try:
        return "v7" in jax.devices()[0].device_kind.lower()
    except Exception:  # pragma: no cover - conservative fallback
        return False


# Footprint cap: in the feature-major layout each batch column costs ~0.5 KB of
# VMEM (double-buffered x/out tiles + transient f32 accumulator), so 16384
# columns is ~8 MiB -- comfortably inside every generation's VMEM.
_MAX_BATCH_TILE = 16384


def _pick_batch_tile(b_pad, prefer_two_steps):
    candidates = [c for c in (16384, 8192, 4096, 2048, 1024, 512, 256, 128)
                  if c <= min(_MAX_BATCH_TILE, b_pad)]
    if prefer_two_steps:
        for c in candidates:
            if b_pad % c == 0 and b_pad // c >= 2:
                return c
    for c in candidates:
        if b_pad % c == 0:
            return c
    return 128  # b_pad is always a multiple of 128; unreachable, kept for safety


def mlp_forward(x, packed_params, *, batch_tile=None):
    """Fused MLP forward.

    x:             [B, inputSize] float32
    packed_params: output of prepare_params (5 layers)
    returns        [B, 1] float32
    """
    B, d_in = x.shape
    b_pad = pl.cdiv(B, 128) * 128

    # Fused transpose + bf16 cast (+ optional batch pad) -> feature-major input.
    xt = jnp.transpose(x).astype(jnp.bfloat16)               # (d_in, B)
    if b_pad != B:
        xt = jnp.pad(xt, ((0, 0), (0, b_pad - B)))

    if batch_tile is None:
        bt = _pick_batch_tile(b_pad, prefer_two_steps=_is_multi_core_chip())
    else:
        bt = batch_tile
        assert b_pad % bt == 0, "batch_tile must divide the (padded) batch"
        assert bt % 128 == 0, "batch_tile must be a multiple of 128"
    grid = (b_pad // bt,)

    kernel_args = [xt]
    in_specs = [pl.BlockSpec((d_in, bt), lambda i: (0, i))]
    for w, b in packed_params:
        kernel_args += [w, b]
        in_specs += [pl.BlockSpec(w.shape, lambda i: (0, 0)),
                     pl.BlockSpec(b.shape, lambda i: (0, 0))]

    out_shape = jax.ShapeDtypeStruct((1, b_pad), jnp.float32)  # lane-dense
    out_spec = pl.BlockSpec((1, bt), lambda i: (0, i))

    flops = 2 * b_pad * sum(int(w.shape[0]) * int(w.shape[1])
                            for w, _ in packed_params)
    bytes_accessed = int(xt.size) * 2 + b_pad * 4 + sum(
        int(w.size) * 2 + int(b.size) * 4 for w, b in packed_params)

    out_t = pl.pallas_call(
        _mlp_kernel,
        out_shape=out_shape,
        grid_spec=pltpu.PrefetchScalarGridSpec(
            num_scalar_prefetch=0,
            grid=grid,
            in_specs=in_specs,
            out_specs=out_spec,
        ),
        compiler_params=pltpu.CompilerParams(
            dimension_semantics=("parallel",),
            vmem_limit_bytes=32 * 1024 * 1024),
        cost_estimate=pl.CostEstimate(
            flops=int(flops), transcendentals=0,
            bytes_accessed=int(bytes_accessed)),
    )(*kernel_args)

    # Back to the PyTorch [B, 1] layout (drop any batch padding).
    return out_t[:, :B].reshape(B, 1)


# ---------------------------------------------------------------------------
# Parameter construction / reference (matches the PyTorch Net)


def _xavier_uniform(key, out_features, in_features):
    # Matches torch.nn.init.xavier_uniform_ on a (out, in) weight matrix.
    limit = jnp.sqrt(6.0 / (in_features + out_features))
    return jax.random.uniform(key, (out_features, in_features),
                              minval=-limit, maxval=limit, dtype=jnp.float32)


def make_params(key, layer_sizes):
    """layer_sizes: [inputSize, h1, h2, h3, h4, 1].
    Returns PyTorch-style [(W [out, in], b [out]), ...] in float32."""
    params = []
    keys = jax.random.split(key, len(layer_sizes) - 1)
    for k, fan_in, fan_out in zip(keys, layer_sizes[:-1], layer_sizes[1:]):
        w = _xavier_uniform(k, fan_out, fan_in)
        b = jnp.zeros((fan_out,), dtype=jnp.float32)
        params.append((w, b))
    return params


def reference_forward(x, params):
    z = x
    for w, b in params[:-1]:
        z = jnp.maximum(z @ w.T + b, 0.0)
    w, b = params[-1]
    return z @ w.T + b


if __name__ == "__main__":
    key = jax.random.PRNGKey(0)
    k_x, k_p = jax.random.split(key)

    # Hyperparameters: inputSize=16, hiddenlayer1..4=32, output=1
    layer_sizes = [16, 32, 32, 32, 32, 1]
    batch = 256

    x = jax.random.normal(k_x, (batch, layer_sizes[0]), dtype=jnp.float32)
    params = make_params(k_p, layer_sizes)
    packed = prepare_params(params)           # one-time packing (hoisted)

    fwd = jax.jit(mlp_forward)                # fuses transpose + bf16 cast of x
    out = jax.block_until_ready(fwd(x, packed))
    ref = reference_forward(x, params)

    assert out.shape == (batch, 1)
    # bf16 MXU inputs with f32 accumulation -> small deviation vs f32 reference.
    assert jnp.allclose(out, ref, atol=3e-2, rtol=3e-2), \
        float(jnp.max(jnp.abs(out - ref)))

    print("KERNEL_OK")
</pallas_src>

<mosaic_0001>
module attributes {stable_mosaic.version = 11 : i64} {
  func.func @_mlp_kernel(%arg0: i32, %arg1: memref<16x256xbf16, #tpu.memory_space<vmem>>, %arg2: memref<32x16xbf16, #tpu.memory_space<vmem>>, %arg3: memref<32x1xf32, #tpu.memory_space<vmem>>, %arg4: memref<32x32xbf16, #tpu.memory_space<vmem>>, %arg5: memref<32x1xf32, #tpu.memory_space<vmem>>, %arg6: memref<32x32xbf16, #tpu.memory_space<vmem>>, %arg7: memref<32x1xf32, #tpu.memory_space<vmem>>, %arg8: memref<32x32xbf16, #tpu.memory_space<vmem>>, %arg9: memref<32x1xf32, #tpu.memory_space<vmem>>, %arg10: memref<1x32xbf16, #tpu.memory_space<vmem>>, %arg11: memref<1x1xf32, #tpu.memory_space<vmem>>, %arg12: memref<1x256xf32, #tpu.memory_space<vmem>>) attributes {dimension_semantics = [#tpu.dimension_semantics<parallel>], iteration_bounds = array<i64: 1>, scalar_prefetch = 0 : i64, scratch_operands = 0 : i64, tpu.core_type = #tpu.core_type<tc>, window_params = [{transform_indices = @transform_0, window_bounds = array<i64: 16, 256>}, {pipeline_mode = #tpu.pipeline_mode<synchronous>, transform_indices = @transform_1, window_bounds = array<i64: 32, 16>}, {pipeline_mode = #tpu.pipeline_mode<synchronous>, transform_indices = @transform_2, window_bounds = array<i64: 32, 1>}, {pipeline_mode = #tpu.pipeline_mode<synchronous>, transform_indices = @transform_3, window_bounds = array<i64: 32, 32>}, {pipeline_mode = #tpu.pipeline_mode<synchronous>, transform_indices = @transform_4, window_bounds = array<i64: 32, 1>}, {pipeline_mode = #tpu.pipeline_mode<synchronous>, transform_indices = @transform_5, window_bounds = array<i64: 32, 32>}, {pipeline_mode = #tpu.pipeline_mode<synchronous>, transform_indices = @transform_6, window_bounds = array<i64: 32, 1>}, {pipeline_mode = #tpu.pipeline_mode<synchronous>, transform_indices = @transform_7, window_bounds = array<i64: 32, 32>}, {pipeline_mode = #tpu.pipeline_mode<synchronous>, transform_indices = @transform_8, window_bounds = array<i64: 32, 1>}, {pipeline_mode = #tpu.pipeline_mode<synchronous>, transform_indices = @transform_9, window_bounds = array<i64: 1, 32>}, {pipeline_mode = #tpu.pipeline_mode<synchronous>, transform_indices = @transform_10, window_bounds = array<i64: 1, 1>}, {transform_indices = @transform_11, window_bounds = array<i64: 1, 256>}]} {
    %c0 = arith.constant 0 : index
    %c0_0 = arith.constant 0 : index
    %0 = vector.load %arg1[%c0, %c0_0] : memref<16x256xbf16, #tpu.memory_space<vmem>>, vector<16x256xbf16>
    %c0_1 = arith.constant 0 : index
    %c0_2 = arith.constant 0 : index
    %1 = vector.load %arg2[%c0_1, %c0_2] : memref<32x16xbf16, #tpu.memory_space<vmem>>, vector<32x16xbf16>
    %cst = arith.constant dense<0.000000e+00> : vector<32x256xf32>
    %2 = tpu.matmul %1, %0, %cst {dimension_numbers = #tpu.dot_dimension_numbers<[1], [0], [0], [1], [0, 0, 1, 1], [], []>} : vector<32x16xbf16>, vector<16x256xbf16>, vector<32x256xf32> -> vector<32x256xf32>
    %c0_3 = arith.constant 0 : index
    %c0_4 = arith.constant 0 : index
    %3 = vector.load %arg3[%c0_3, %c0_4] : memref<32x1xf32, #tpu.memory_space<vmem>>, vector<32x1xf32>
    %4 = vector.broadcast %3 : vector<32x1xf32> to vector<32x256xf32>
    %5 = arith.addf %2, %4 : vector<32x256xf32>
    %cst_5 = arith.constant 0.000000e+00 : f32
    %6 = vector.broadcast %cst_5 : f32 to vector<32x256xf32>
    %7 = arith.maximumf %5, %6 : vector<32x256xf32>
    %8 = arith.truncf %7 : vector<32x256xf32> to vector<32x256xbf16>
    %c0_6 = arith.constant 0 : index
    %c0_7 = arith.constant 0 : index
    %9 = vector.load %arg4[%c0_6, %c0_7] : memref<32x32xbf16, #tpu.memory_space<vmem>>, vector<32x32xbf16>
    %cst_8 = arith.constant dense<0.000000e+00> : vector<32x256xf32>
    %10 = tpu.matmul %9, %8, %cst_8 {dimension_numbers = #tpu.dot_dimension_numbers<[1], [0], [0], [1], [0, 0, 1, 1], [], []>} : vector<32x32xbf16>, vector<32x256xbf16>, vector<32x256xf32> -> vector<32x256xf32>
    %c0_9 = arith.constant 0 : index
    %c0_10 = arith.constant 0 : index
    %11 = vector.load %arg5[%c0_9, %c0_10] : memref<32x1xf32, #tpu.memory_space<vmem>>, vector<32x1xf32>
    %12 = vector.broadcast %11 : vector<32x1xf32> to vector<32x256xf32>
    %13 = arith.addf %10, %12 : vector<32x256xf32>
    %cst_11 = arith.constant 0.000000e+00 : f32
    %14 = vector.broadcast %cst_11 : f32 to vector<32x256xf32>
    %15 = arith.maximumf %13, %14 : vector<32x256xf32>
    %16 = arith.truncf %15 : vector<32x256xf32> to vector<32x256xbf16>
    %c0_12 = arith.constant 0 : index
    %c0_13 = arith.constant 0 : index
    %17 = vector.load %arg6[%c0_12, %c0_13] : memref<32x32xbf16, #tpu.memory_space<vmem>>, vector<32x32xbf16>
    %cst_14 = arith.constant dense<0.000000e+00> : vector<32x256xf32>
    %18 = tpu.matmul %17, %16, %cst_14 {dimension_numbers = #tpu.dot_dimension_numbers<[1], [0], [0], [1], [0, 0, 1, 1], [], []>} : vector<32x32xbf16>, vector<32x256xbf16>, vector<32x256xf32> -> vector<32x256xf32>
    %c0_15 = arith.constant 0 : index
    %c0_16 = arith.constant 0 : index
    %19 = vector.load %arg7[%c0_15, %c0_16] : memref<32x1xf32, #tpu.memory_space<vmem>>, vector<32x1xf32>
    %20 = vector.broadcast %19 : vector<32x1xf32> to vector<32x256xf32>
    %21 = arith.addf %18, %20 : vector<32x256xf32>
    %cst_17 = arith.constant 0.000000e+00 : f32
    %22 = vector.broadcast %cst_17 : f32 to vector<32x256xf32>
    %23 = arith.maximumf %21, %22 : vector<32x256xf32>
    %24 = arith.truncf %23 : vector<32x256xf32> to vector<32x256xbf16>
    %c0_18 = arith.constant 0 : index
    %c0_19 = arith.constant 0 : index
    %25 = vector.load %arg8[%c0_18, %c0_19] : memref<32x32xbf16, #tpu.memory_space<vmem>>, vector<32x32xbf16>
    %cst_20 = arith.constant dense<0.000000e+00> : vector<32x256xf32>
    %26 = tpu.matmul %25, %24, %cst_20 {dimension_numbers = #tpu.dot_dimension_numbers<[1], [0], [0], [1], [0, 0, 1, 1], [], []>} : vector<32x32xbf16>, vector<32x256xbf16>, vector<32x256xf32> -> vector<32x256xf32>
    %c0_21 = arith.constant 0 : index
    %c0_22 = arith.constant 0 : index
    %27 = vector.load %arg9[%c0_21, %c0_22] : memref<32x1xf32, #tpu.memory_space<vmem>>, vector<32x1xf32>
    %28 = vector.broadcast %27 : vector<32x1xf32> to vector<32x256xf32>
    %29 = arith.addf %26, %28 : vector<32x256xf32>
    %cst_23 = arith.constant 0.000000e+00 : f32
    %30 = vector.broadcast %cst_23 : f32 to vector<32x256xf32>
    %31 = arith.maximumf %29, %30 : vector<32x256xf32>
    %32 = arith.truncf %31 : vector<32x256xf32> to vector<32x256xbf16>
    %c0_24 = arith.constant 0 : index
    %c0_25 = arith.constant 0 : index
    %33 = vector.load %arg10[%c0_24, %c0_25] : memref<1x32xbf16, #tpu.memory_space<vmem>>, vector<1x32xbf16>
    %cst_26 = arith.constant dense<0.000000e+00> : vector<1x256xf32>
    %34 = tpu.matmul %33, %32, %cst_26 {dimension_numbers = #tpu.dot_dimension_numbers<[1], [0], [0], [1], [0, 0, 1, 1], [], []>} : vector<1x32xbf16>, vector<32x256xbf16>, vector<1x256xf32> -> vector<1x256xf32>
    %c0_27 = arith.constant 0 : index
    %c0_28 = arith.constant 0 : index
    %35 = vector.load %arg11[%c0_27, %c0_28] : memref<1x1xf32, #tpu.memory_space<vmem>>, vector<1x1xf32>
    %36 = vector.broadcast %35 : vector<1x1xf32> to vector<1x256xf32>
    %37 = arith.addf %34, %36 : vector<1x256xf32>
    %c0_29 = arith.constant 0 : index
    %c0_30 = arith.constant 0 : index
    %38 = vector.load %arg12[%c0_29, %c0_30] : memref<1x256xf32, #tpu.memory_space<vmem>>, vector<1x256xf32>
    tpu.vector_store %arg12[%c0_29, %c0_30], %37 {strides = array<i32>} : memref<1x256xf32, #tpu.memory_space<vmem>>, vector<1x256xf32>,
    return
  }
  func.func @transform_0(%arg0: i32) -> (i32, i32) {
    %c0_i32 = arith.constant 0 : i32
    %c0_i32_0 = arith.constant 0 : i32
    return %c0_i32, %arg0 : i32, i32
  }
  func.func @transform_1(%arg0: i32) -> (i32, i32) {
    %c0_i32 = arith.constant 0 : i32
    %c0_i32_0 = arith.constant 0 : i32
    %c0_i32_1 = arith.constant 0 : i32
    return %c0_i32, %c0_i32_0 : i32, i32
  }
  func.func @transform_2(%arg0: i32) -> (i32, i32) {
    %c0_i32 = arith.constant 0 : i32
    %c0_i32_0 = arith.constant 0 : i32
    %c0_i32_1 = arith.constant 0 : i32
    return %c0_i32, %c0_i32_0 : i32, i32
  }
  func.func @transform_3(%arg0: i32) -> (i32, i32) {
    %c0_i32 = arith.constant 0 : i32
    %c0_i32_0 = arith.constant 0 : i32
    %c0_i32_1 = arith.constant 0 : i32
    return %c0_i32, %c0_i32_0 : i32, i32
  }
  func.func @transform_4(%arg0: i32) -> (i32, i32) {
    %c0_i32 = arith.constant 0 : i32
    %c0_i32_0 = arith.constant 0 : i32
    %c0_i32_1 = arith.constant 0 : i32
    return %c0_i32, %c0_i32_0 : i32, i32
  }
  func.func @transform_5(%arg0: i32) -> (i32, i32) {
    %c0_i32 = arith.constant 0 : i32
    %c0_i32_0 = arith.constant 0 : i32
    %c0_i32_1 = arith.constant 0 : i32
    return %c0_i32, %c0_i32_0 : i32, i32
  }
  func.func @transform_6(%arg0: i32) -> (i32, i32) {
    %c0_i32 = arith.constant 0 : i32
    %c0_i32_0 = arith.constant 0 : i32
    %c0_i32_1 = arith.constant 0 : i32
    return %c0_i32, %c0_i32_0 : i32, i32
  }
  func.func @transform_7(%arg0: i32) -> (i32, i32) {
    %c0_i32 = arith.constant 0 : i32
    %c0_i32_0 = arith.constant 0 : i32
    %c0_i32_1 = arith.constant 0 : i32
    return %c0_i32, %c0_i32_0 : i32, i32
  }
  func.func @transform_8(%arg0: i32) -> (i32, i32) {
    %c0_i32 = arith.constant 0 : i32
    %c0_i32_0 = arith.constant 0 : i32
    %c0_i32_1 = arith.constant 0 : i32
    return %c0_i32, %c0_i32_0 : i32, i32
  }
  func.func @transform_9(%arg0: i32) -> (i32, i32) {
    %c0_i32 = arith.constant 0 : i32
    %c0_i32_0 = arith.constant 0 : i32
    %c0_i32_1 = arith.constant 0 : i32
    return %c0_i32, %c0_i32_0 : i32, i32
  }
  func.func @transform_10(%arg0: i32) -> (i32, i32) {
    %c0_i32 = arith.constant 0 : i32
    %c0_i32_0 = arith.constant 0 : i32
    %c0_i32_1 = arith.constant 0 : i32
    return %c0_i32, %c0_i32_0 : i32, i32
  }
  func.func @transform_11(%arg0: i32) -> (i32, i32) {
    %c0_i32 = arith.constant 0 : i32
    %c0_i32_0 = arith.constant 0 : i32
    return %c0_i32, %arg0 : i32, i32
  }
}

</mosaic_0001>

<bundles_post_ra>
// kernel: mlp_forward.1
= control target key start
LH: loop header
LB: loop body
LE: loop exit
PB: predicated region body
PF: predicated region fallthrough
CT: control target
= control target key end

     0   :  { %s822_s0 = inlined_call_operand.vmem [shape: bf16[16,256], index: 0, kind: input, shape index: {}]   ;;  %s823_s1 = inlined_call_operand.vmem [shape: bf16[32,16], index: 1, kind: input, shape index: {}]   ;;  %s824_s2 = inlined_call_operand.vmem [shape: f32[32,1], index: 2, kind: input, shape index: {}]   ;;  %s825_s3 = inlined_call_operand.vmem [shape: bf16[32,32], index: 3, kind: input, shape index: {}]   ;;  %s826_s4 = inlined_call_operand.vmem [shape: f32[32,1], index: 4, kind: input, shape index: {}]   ;;  %s827_s5 = inlined_call_operand.vmem [shape: bf16[32,32], index: 5, kind: input, shape index: {}]   ;;  %s828_s6 = inlined_call_operand.vmem [shape: f32[32,1], index: 6, kind: input, shape index: {}]   ;;  %s829_s7 = inlined_call_operand.vmem [shape: bf16[32,32], index: 7, kind: input, shape index: {}]   ;;  %s830_s8 = inlined_call_operand.vmem [shape: f32[32,1], index: 8, kind: input, shape index: {}]   ;;  %s831_s9 = inlined_call_operand.vmem [shape: bf16[1,32], index: 9, kind: input, shape index: {}]   ;;  %s832_s10 = inlined_call_operand.<no memory space> [shape: f32[1,1], index: 10, kind: input, shape index: {}]   ;;  %s833_s11 = inlined_call_operand.hbm [shape: f32[1,256], index: 11, kind: output, shape index: {}]  }
   0x1   :  { %v16_v0 = vstv %s832_s10 }
   0x2   :  { %17 = vst [vmem:[#allocation2] sm:$0x1] %v16_v0 }
   0x3   :  { %v608_v1 = vld [vmem:[%s822_s0 + $0x4] ss:$8 sps:$4 sm:$0xff]   ;;  %v610_v2 = vld [vmem:[%s822_s0] ss:$8 sps:$4 sm:$0xff]   ;;  %v643_v3 = vmov 0   ;;  %vm92_vm0 = vcmask 130048  }
   0x4   :  { %131 = vmatprep.mubr.bf16.mxu0 %v643_v3  ;;  %606 = vset.pattern.permute.xlu0 %v643_v3  ;;  %v611_v4 = vld [vmem:[%s823_s1] sm:$0xff]   ;;  %v50_v6 = vld [vmem:[%s824_s2 + $0x10] sm:$0xff]  ;;  %v49_v7 = vld [vmem:[%s824_s2 + $0x8] sm:$0xff] }
   0x5   :  { %99 = vmatprep.subr.bf16.mxu0 %v608_v1  ;;  %607 = vset.pattern.permute.xlu1 %v643_v3  ;;  %v48_v5 = vld [vmem:[%s824_s2] sm:$0xff]  ;;  %v51_v8 = vld [vmem:[%s824_s2 + $0x18] sm:$0xff]  ;;  %v612_v9 = vld [vmem:[%s823_s1 + $0x8] sm:$0xff]  }
   0x6   :  { %100 = vmatpush1.bf16.msra.mxu0 %v610_v2  ;;  %241 = vmatprep.mubr.bf16.mxu1 %v643_v3  ;;  %v168_v10 = vld [vmem:[%s826_s4] sm:$0xff]  ;;  %v169_v11 = vld [vmem:[%s826_s4 + $0x8] sm:$0xff]  ;;  %v170_v12 = vld [vmem:[%s826_s4 + $0x10] sm:$0xff] }
   0x7   :  { %54 = vperm.xlu0 %606, %v48_v5   ;;  %64 = vperm.xlu1 %607, %v50_v6  }
   0x9   :  { %588 = vmatmul.mubr.msk.bf16.vlgmr.msra.gmra.mrb[0].mxu0 %vm92_vm0, %v611_v4 }
   0xa   :  { %141 = vmatprep.mubr.bf16.mxu0 %v643_v3 }
   0xb   :  { %59 = vperm.xlu0 %606, %v49_v7   ;;  %69 = vperm.xlu1 %607, %v51_v8  }
   0xf   :  { %174 = vperm.xlu0 %606, %v168_v10   ;;  %179 = vperm.xlu1 %607, %v169_v11  }
  0x10   :  { %18 = vsyncpa [#allocation4], 0  ;;  %v171_v13 = vld [vmem:[%s826_s4 + $0x18] sm:$0xff]  ;;  %v278_v14 = vld [vmem:[%s828_s6] sm:$0xff]  ;;  %vm202_vm1 = vcmask 261120   ;;  %s645_s21 = smov [#allocation3]  }
  0x11   :  { %589 = vmatmul.mubr.msk.bf16.gmra.mrb[4].mxu0 %vm92_vm0, %v612_v9  ;;  %v279_v15 = vld [vmem:[%s828_s6 + $0x8] sm:$0xff]  ;;  %v280_v16 = vld [vmem:[%s828_s6 + $0x10] sm:$0xff]  ;;  %v281_v17 = vld [vmem:[%s828_s6 + $0x18] sm:$0xff] }
  0x12   :  { %350 = vmatprep.mubr.bf16.mxu0 %v643_v3  ;;  %v387_v18 = vld [vmem:[%s830_s8] sm:$0xff]  ;;  %v388_v19 = vld [vmem:[%s830_s8 + $0x8] sm:$0xff]  ;;  %v389_v20 = vld [vmem:[%s830_s8 + $0x10] sm:$0xff] }
  0x13   :  { %184 = vperm.xlu0 %606, %v170_v12   ;;  %189 = vperm.xlu1 %607, %v171_v13   ;;  %v390_v21 = vld [vmem:[%s830_s8 + $0x18] sm:$0xff]  ;;  %v493_v22 = vld [vmem:[#allocation2] sm:$0x1]  ;;  %v614_v56 = vld [vmem:[%s825_s3 + $0x8] sm:$0xff]  }
  0x14   :  { %v613_v55 = vld [vmem:[%s825_s3] sm:$0xff]  }
  0x17   :  { %284 = vperm.xlu0 %606, %v278_v14   ;;  %289 = vperm.xlu1 %607, %v279_v15  }
  0x1b   :  { %294 = vperm.xlu0 %606, %v280_v16   ;;  %299 = vperm.xlu1 %607, %v281_v17  }
  0x1f   :  { %393 = vperm.xlu0 %606, %v387_v18   ;;  %398 = vperm.xlu1 %607, %v388_v19  }
  0x23   :  { %403 = vperm.xlu0 %606, %v389_v20   ;;  %408 = vperm.xlu1 %607, %v390_v21  }
  0x27   :  { %496 = vperm.xlu0 %606, %v493_v22  }
  0x86   :  { %v55_v23 = vpop.permute.xlu0 %54  ;;  %v65_v32 = vpop.permute.xlu1 %64 }
  0x8a   :  { %v60_v27 = vpop.permute.xlu0 %59  ;;  %v70_v43 = vpop.permute.xlu1 %69 }
  0x8e   :  { %v175_v57 = vpop.permute.xlu0 %174  ;;  %v180_v61 = vpop.permute.xlu1 %179 }
  0x92   :  { %v185_v9 = vpop.permute.xlu0 %184  ;;  %v190_v14 = vpop.permute.xlu1 %189 }
  0xdc   :  { %v133_v24 = vpop.f32.mrb[0].mxu0 }
  0xdd   :  { %v134_v25 = vadd.f32 %v133_v24, %v55_v23  ;;  %v135_v26 = vpop.f32.mrb[1].mxu0 }
  0xde   :  { %v136_v28 = vadd.f32 %v135_v26, %v55_v23  ;;  %v137_v29 = vpop.f32.mrb[2].mxu0  ;;  %v615_v26 = vld [vmem:[%s827_s5] sm:$0xff]  }
  0xdf   :  { %v138_v30 = vadd.f32 %v137_v29, %v60_v27  ;;  %v139_v31 = vpop.f32.mrb[3].mxu0  ;;  %v152_v34 = vmax.f32 %v134_v25, 0.0 }
  0xe0   :  { %v140_v33 = vadd.f32 %v139_v31, %v60_v27  ;;  %v153_v36 = vmax.f32 %v136_v28, 0.0  ;;  %v616_v27 = vld [vmem:[%s827_s5 + $0x8] sm:$0xff]   ;;  %v285_v28 = vpop.permute.xlu0 %284 }
  0xe1   :  { %v154_v35 = vmax.f32 %v138_v30, 0.0 }
  0xe2   :  { %v155_v37 = vmax.f32 %v140_v33, 0.0 }
  0xe3   :  { %v160_v38 = vpack.c.bf16 %v154_v35, %v152_v34 }
  0xe4   :  { %v143_v39 = vpop.f32.mrb[4].mxu0  ;;  %v161_v40 = vpack.c.bf16 %v155_v37, %v153_v36 }
  0xe5   :  { %v144_v41 = vadd.f32 %v143_v39, %v65_v32  ;;  %v145_v42 = vpop.f32.mrb[5].mxu0 }
  0xe6   :  { %v146_v44 = vadd.f32 %v145_v42, %v65_v32  ;;  %v147_v45 = vpop.f32.mrb[6].mxu0  ;;  %209 = vmatprep.subr.bf16.mxu1 %v161_v40  ;;  %v290_v32 = vpop.permute.xlu1 %289 }
  0xe7   :  { %v148_v46 = vadd.f32 %v147_v45, %v70_v43  ;;  %v149_v47 = vpop.f32.mrb[7].mxu0  ;;  %210 = vmatpush1.bf16.msra.mxu1 %v160_v38  ;;  %v156_v49 = vmax.f32 %v144_v41, 0.0 }
  0xe8   :  { %v150_v48 = vadd.f32 %v149_v47, %v70_v43  ;;  %v157_v51 = vmax.f32 %v146_v44, 0.0  ;;  %v295_v43 = vpop.permute.xlu0 %294 }
  0xe9   :  { %v158_v50 = vmax.f32 %v148_v46, 0.0 }
  0xea   :  { %v159_v52 = vmax.f32 %v150_v48, 0.0  ;;  %v300_v48 = vpop.permute.xlu1 %299 }
  0xeb   :  { %v162_v53 = vpack.c.bf16 %v158_v50, %v156_v49 }
  0xec   :  { %v163_v54 = vpack.c.bf16 %v159_v52, %v157_v51 }
  0xee   :  { %211 = vmatprep.subr.bf16.mxu1 %v163_v54 }
  0xef   :  { %212 = vmatpush1.bf16.msra.mxu1 %v162_v53 }
  0xf2   :  { %592 = vmatmul.mubr.msk.bf16.vlgmr.msra.gmra.mrb[0].mxu1 %vm202_vm1, %v613_v55 }
  0xf3   :  { %251 = vmatprep.mubr.bf16.mxu1 %v643_v3 }
  0xfa   :  { %593 = vmatmul.mubr.msk.bf16.gmra.mrb[4].mxu1 %vm202_vm1, %v614_v56 }
  0xfb   :  { %459 = vmatprep.mubr.bf16.mxu1 %v643_v3 }
 0x1c5   :  { %v243_v58 = vpop.f32.mrb[0].mxu1 }
 0x1c6   :  { %v244_v59 = vadd.f32 %v243_v58, %v175_v57  ;;  %v245_v60 = vpop.f32.mrb[1].mxu1 }
 0x1c7   :  { %v246_v62 = vadd.f32 %v245_v60, %v175_v57  ;;  %v247_v63 = vpop.f32.mrb[2].mxu1  ;;  %v617_v60 = vld [vmem:[%s829_s7] sm:$0xff]  }
 0x1c8   :  { %v248_v0 = vadd.f32 %v247_v63, %v180_v61  ;;  %v249_v1 = vpop.f32.mrb[3].mxu1  ;;  %v262_v4 = vmax.f32 %v244_v59, 0.0 }
 0x1c9   :  { %v250_v2 = vadd.f32 %v249_v1, %v180_v61  ;;  %v263_v6 = vmax.f32 %v246_v62, 0.0  ;;  %v618_v61 = vld [vmem:[%s829_s7 + $0x8] sm:$0xff]   ;;  %v394_v62 = vpop.permute.xlu0 %393 }
 0x1ca   :  { %v264_v5 = vmax.f32 %v248_v0, 0.0 }
 0x1cb   :  { %v265_v7 = vmax.f32 %v250_v2, 0.0  ;;  %v399_v2 = vpop.permute.xlu1 %398 }
 0x1cc   :  { %v270_v8 = vpack.c.bf16 %v264_v5, %v262_v4 }
 0x1cd   :  { %v271_v10 = vpack.c.bf16 %v265_v7, %v263_v6  ;;  %v253_v11 = vpop.f32.mrb[4].mxu1 }
 0x1ce   :  { %v254_v12 = vadd.f32 %v253_v11, %v185_v9  ;;  %v255_v13 = vpop.f32.mrb[5].mxu1 }
 0x1cf   :  { %v256_v15 = vadd.f32 %v255_v13, %v185_v9  ;;  %v257_v16 = vpop.f32.mrb[6].mxu1  ;;  %318 = vmatprep.subr.bf16.mxu0 %v271_v10  ;;  %v404_v13 = vpop.permute.xlu0 %403 }
 0x1d0   :  { %v258_v17 = vadd.f32 %v257_v16, %v190_v14  ;;  %v259_v18 = vpop.f32.mrb[7].mxu1  ;;  %319 = vmatpush1.bf16.msra.mxu0 %v270_v8  ;;  %v266_v20 = vmax.f32 %v254_v12, 0.0 }
 0x1d1   :  { %v260_v19 = vadd.f32 %v259_v18, %v190_v14  ;;  %v267_v22 = vmax.f32 %v256_v15, 0.0  ;;  %v409_v18 = vpop.permute.xlu1 %408 }
 0x1d2   :  { %v268_v21 = vmax.f32 %v258_v17, 0.0 }
 0x1d3   :  { %v269_v23 = vmax.f32 %v260_v19, 0.0 }
 0x1d4   :  { %v272_v24 = vpack.c.bf16 %v268_v21, %v266_v20 }
 0x1d5   :  { %v273_v25 = vpack.c.bf16 %v269_v23, %v267_v22 }
 0x1d7   :  { %320 = vmatprep.subr.bf16.mxu0 %v273_v25 }
 0x1d8   :  { %321 = vmatpush1.bf16.msra.mxu0 %v272_v24 }
 0x1db   :  { %596 = vmatmul.mubr.msk.bf16.vlgmr.msra.gmra.mrb[8].mxu0 %vm202_vm1, %v615_v26 }
 0x1dc   :  { %360 = vmatprep.mubr.bf16.mxu0 %v643_v3 }
 0x1e3   :  { %597 = vmatmul.mubr.msk.bf16.gmra.mrb[12].mxu0 %vm202_vm1, %v616_v27 }
 0x1e4   :  { %538 = vmatprep.mubr.bf16.mxu0 %v643_v3 }
 0x2ae   :  { %v352_v29 = vpop.f32.mrb[8].mxu0 }
 0x2af   :  { %v353_v30 = vadd.f32 %v352_v29, %v285_v28  ;;  %v354_v31 = vpop.f32.mrb[9].mxu0 }
 0x2b0   :  { %v355_v33 = vadd.f32 %v354_v31, %v285_v28  ;;  %v356_v34 = vpop.f32.mrb[10].mxu0  ;;  %v499_v31 = vlaneseq }
 0x2b1   :  { %v357_v35 = vadd.f32 %v356_v34, %v290_v32  ;;  %v358_v36 = vpop.f32.mrb[11].mxu0  ;;  %v371_v38 = vmax.f32 %v353_v30, 0.0  ;;  %v492_v30 = vld [vmem:[%s831_s9] sm:$0x1]  ;;  %s576_s9 = sshll.u32 %s645_s21, 4  ;;  %s577_s9 = int_to_ptr.vmem [resolvable:$true] %s576_s9 }
 0x2b2   :  { %v359_v37 = vadd.f32 %v358_v36, %v290_v32  ;;  %v372_v40 = vmax.f32 %v355_v33, 0.0  ;;  %v500_v32 = vshrl.u32 %v499_v31, 7  ;;  %v644_v33 = vmov 1966171168   ;;  %v497_v36 = vpop.permute.xlu0 %496  ;;  %s619_s22 = scalar_lea.vmem %s577_s9, 32  ;;  %p624_p1 = scmp.lt.s32.totalorder %s577_s9, %s577_s9 }
 0x2b3   :  { %v373_v39 = vmax.f32 %v357_v35, 0.0  ;;  %v551_v34 = vunpack.c.l.s4 %v644_v33  ;;  %vm567_vm2 = vcmp.lt.s32.totalorder %v499_v31, 256  ;;  %p620_p0 = scmp.ne.s32.totalorder %s577_s9, %s619_s22  ;;  %p625_p2 = scmp.lt.s32.totalorder %s619_s22, %s619_s22 }
 0x2b4   :  { %v374_v41 = vmax.f32 %v359_v37, 0.0  ;;  %v501_v35 = vsub.s32 0, %v500_v32 }
 0x2b5   :  { %v379_v42 = vpack.c.bf16 %v373_v39, %v371_v38  ;;  %v552_v37 = vunpack.c.0.s8 %v551_v34  ;;  %p626_p3 = por %p625_p2, %p624_p1 }
 0x2b6   :  { %v380_v44 = vpack.c.bf16 %v374_v41, %v372_v40  ;;  %v362_v45 = vpop.f32.mrb[12].mxu0  ;;  %v502_v38 = vrot.slane %v497_v36, %v501_v35 }
 0x2b7   :  { %v363_v46 = vadd.f32 %v362_v45, %v295_v43  ;;  %v364_v47 = vpop.f32.mrb[13].mxu0  ;;  %p627_p4 = pnand %p626_p3, %p620_p0 }
 0x2b8   :  { %v365_v49 = vadd.f32 %v364_v47, %v295_v43  ;;  %v366_v50 = vpop.f32.mrb[14].mxu0  ;;  %427 = vmatprep.subr.bf16.mxu1 %v380_v44  ;;  %v555_v43 = vsub.s32 %v552_v37, %v500_v32 }
 0x2b9   :  { %v367_v51 = vadd.f32 %v366_v50, %v300_v48  ;;  %v368_v52 = vpop.f32.mrb[15].mxu0  ;;  %428 = vmatpush1.bf16.msra.mxu1 %v379_v42  ;;  %v375_v54 = vmax.f32 %v363_v46, 0.0 }
 0x2ba   :  { %v369_v53 = vadd.f32 %v368_v52, %v300_v48  ;;  %v376_v56 = vmax.f32 %v365_v49, 0.0 }
 0x2bb   :  { %v377_v55 = vmax.f32 %v367_v51, 0.0 }
 0x2bc   :  { %v378_v57 = vmax.f32 %v369_v53, 0.0 }
 0x2bd   :  { %v381_v58 = vpack.c.bf16 %v377_v55, %v375_v54 }
 0x2be   :  { %v382_v59 = vpack.c.bf16 %v378_v57, %v376_v56 }
 0x2c0   :  { %429 = vmatprep.subr.bf16.mxu1 %v382_v59 }
 0x2c1   :  { %430 = vmatpush1.bf16.msra.mxu1 %v381_v58 }
 0x2c4   :  { %600 = vmatmul.mubr.msk.bf16.vlgmr.msra.gmra.mrb[8].mxu1 %vm202_vm1, %v617_v60 }
 0x2c5   :  { %469 = vmatprep.mubr.bf16.mxu1 %v643_v3 }
 0x2cc   :  { %601 = vmatmul.mubr.msk.bf16.gmra.mrb[12].mxu1 %vm202_vm1, %v618_v61 }
 0x397   :  { %v461_v63 = vpop.f32.mrb[8].mxu1 }
 0x398   :  { %v462_v0 = vadd.f32 %v461_v63, %v394_v62  ;;  %v463_v1 = vpop.f32.mrb[9].mxu1 }
 0x399   :  { %v464_v4 = vadd.f32 %v463_v1, %v394_v62  ;;  %v465_v5 = vpop.f32.mrb[10].mxu1 }
 0x39a   :  { %v466_v6 = vadd.f32 %v465_v5, %v399_v2  ;;  %v467_v7 = vpop.f32.mrb[11].mxu1  ;;  %v480_v9 = vmax.f32 %v462_v0, 0.0 }
 0x39b   :  { %v468_v8 = vadd.f32 %v467_v7, %v399_v2  ;;  %v481_v11 = vmax.f32 %v464_v4, 0.0 }
 0x39c   :  { %v482_v10 = vmax.f32 %v466_v6, 0.0 }
 0x39d   :  { %v483_v3 = vmax.f32 %v468_v8, 0.0 }
 0x39e   :  { %v488_v12 = vpack.c.bf16 %v482_v10, %v480_v9 }
 0x39f   :  { %v489_v14 = vpack.c.bf16 %v483_v3, %v481_v11  ;;  %v471_v15 = vpop.f32.mrb[12].mxu1 }
 0x3a0   :  { %v472_v16 = vadd.f32 %v471_v15, %v404_v13  ;;  %v473_v17 = vpop.f32.mrb[13].mxu1 }
 0x3a1   :  { %v474_v19 = vadd.f32 %v473_v17, %v404_v13  ;;  %v475_v20 = vpop.f32.mrb[14].mxu1  ;;  %506 = vmatprep.subr.bf16.mxu0 %v489_v14 }
 0x3a2   :  { %v476_v21 = vadd.f32 %v475_v20, %v409_v18  ;;  %v477_v22 = vpop.f32.mrb[15].mxu1  ;;  %507 = vmatpush1.bf16.msra.mxu0 %v488_v12  ;;  %v484_v24 = vmax.f32 %v472_v16, 0.0 }
 0x3a3   :  { %v478_v23 = vadd.f32 %v477_v22, %v409_v18  ;;  %v485_v26 = vmax.f32 %v474_v19, 0.0 }
 0x3a4   :  { %v486_v25 = vmax.f32 %v476_v21, 0.0 }
 0x3a5   :  { %v487_v27 = vmax.f32 %v478_v23, 0.0 }
 0x3a6   :  { %v490_v28 = vpack.c.bf16 %v486_v25, %v484_v24 }
 0x3a7   :  { %v491_v29 = vpack.c.bf16 %v487_v27, %v485_v26 }
 0x3a9   :  { %508 = vmatprep.subr.bf16.mxu0 %v491_v29 }
 0x3aa   :  { %509 = vmatpush1.bf16.msra.mxu0 %v490_v28 }
 0x3ad   :  { %602 = vmatmul.mubr.msk.bf16.vlgmr.msra.gmra.mrb[16].mxu0 %vm202_vm1, %v492_v30 }
 0x480   :  { %v540_v39 = vpop.f32.mrb[16].mxu0 }
 0x481   :  { %v541_v40 = vadd.f32 %v540_v39, %v502_v38  ;;  %v542_v41 = vpop.f32.mrb[17].mxu0 }
 0x482   :  { %v543_v42 = vadd.f32 %v542_v41, %v502_v38  ;;  %v544_v44 = vpop.f32.mrb[18].mxu0 }
 0x483   :  { %v545_v45 = vpop.f32.mrb[19].mxu0 }
 0x484   :  { %v549_v46 = vcombine.low %v541_v40, %v543_v42 }
 0x486   :  { %v556_v47 = vrot.slane %v549_v46, %v555_v43 }
 0x488   :  { %v563_v48 = vrot.slane %v556_v47, %v555_v43 }
 0x48a   :  { %569 = vst.msk [vmem:[#allocation3] sm:$0x3] %vm567_vm2, %v563_v48 }
 0x48b   :  { %630 = shalt.err (!%p627_p4)
}
 0x48c   :  { %s631_s10 = scalar_lea.hbm %s833_s11, 32 }
 0x48d   :  { %p632_p5 = scmp.ne.s32.totalorder %s833_s11, %s631_s10  ;;  %p635_p6 = scmp.lt.u32.totalorder %s631_s10, %s833_s11 }
 0x48f   :  { %p637_p7 = pnand %p635_p6, %p632_p5 }
 0x491   :  { %640 = shalt.err (!%p637_p7)
}
 0x492   :  { %579 = dma.vmem_to_hbm [thread:$0]  %s577_s9, 32, %s833_s11, [#allocation4]  }
 0x493   :  { %641 = dma.done.wait [#allocation4], 32  }
 0x494   :  { %642 = vsyncadd [#allocation4], 4294967264 }
 0x495   :  { %583 = vsyncpa [#allocation4], 1 }

</bundles_post_ra>
